<compile_context>
chip_gen: v7x
topology: tpu7x:2x2x1
jax: 0.10.0
libtpu: 0.0.40
codegen_flags: <defaults>
</compile_context>

<pallas_src>
import functools

import numpy as np
import jax
import jax.numpy as jnp
from jax import lax
from jax.experimental import pallas as pl
from jax.experimental.pallas import tpu as pltpu


def _dot_nt(a, b):
    """a @ b.T with f32 accumulation (contracts last dim of both operands)."""
    return lax.dot_general(
        a, b, (((1,), (1,)), ((), ())), preferred_element_type=jnp.float32
    )


# ---------------------------------------------------------------------------
# Kernel 1: QKV -> per-head attention -> scramble -> (fc ∘ l1) + bias
# ---------------------------------------------------------------------------
def _fused_mha_kernel(n_heads, d_k, d_v, g,
                      x_ref, wqkv_ref, wct_ref, b_ref, o_ref, t_ref):
    """
    x_ref   : (N, D)       input rows
    wqkv_ref: (3*D, D)     [W_Q / sqrt(d_k); W_K; W_V]  (PyTorch (out, in) layout)
    wct_ref : (D, O)       (W_l1 @ W_fc).T   (fc and l1 merged, fc has no bias)
    b_ref   : (1, O)       l1 bias
    o_ref   : (N, O)       output
    t_ref   : (D, N) VMEM  scratch: permuted, transposed context
    """
    X = x_ref[...]                                   # (N, D)
    N, D = X.shape

    # --- one batched QKV projection (single MXU matmul) --------------------
    qkv = _dot_nt(X, wqkv_ref[...])                  # (N, 3*D); Q part pre-scaled

    # --- per-head attention (H small & static -> unrolled) -----------------
    for h in range(n_heads):
        q = qkv[:, h * d_k:(h + 1) * d_k]                    # (N, d_k)
        k = qkv[:, D + h * d_k:D + (h + 1) * d_k]            # (N, d_k)
        v = qkv[:, 2 * D + h * d_v:2 * D + (h + 1) * d_v]    # (N, d_v)

        s = _dot_nt(q, k)                                    # (N, N), pre-scaled
        m = jnp.max(s, axis=-1, keepdims=True)
        p = jnp.exp(s - m)
        inv = pl.reciprocal(jnp.sum(p, axis=-1, keepdims=True), approx=True)
        attn = p * inv                                       # row softmax

        ctx = jnp.dot(attn, v, preferred_element_type=jnp.float32)  # (N, d_v)
        t_h = ctx.T                                          # (d_v, N)

        # The module does context.transpose(1, 2).reshape(-1, H*d_v), i.e. a
        # row-major rewrap of T (D, N) -> (N, D) with T row i = h*d_v + d.
        # Store T row i at scratch row (i % g)*N + (i // g) so that the
        # scrambled context becomes g contiguous (N, N) blocks consumed
        # directly by the final projection matmuls (static-index VMEM stores).
        for d in range(d_v):
            i = h * d_v + d
            r, a = divmod(i, g)
            dst = a * N + r
            t_ref[dst:dst + 1, :] = t_h[d:d + 1, :]

    # --- fused fc + l1 projection ------------------------------------------
    # out = context_rs @ (W_l1 @ W_fc).T + b
    #     = sum_a  t_perm[a*N:(a+1)*N, :] @ WcT[a*N:(a+1)*N, :]  + b
    acc = jnp.dot(t_ref[0:N, :], wct_ref[0:N, :],
                  preferred_element_type=jnp.float32)        # (N, O)
    for a in range(1, g):
        acc = acc + jnp.dot(t_ref[a * N:(a + 1) * N, :],
                            wct_ref[a * N:(a + 1) * N, :],
                            preferred_element_type=jnp.float32)
    o_ref[...] = acc + b_ref[...]


def multi_head_attention(x, params, *, n_heads):
    N, input_dim = x.shape
    assert input_dim % n_heads == 0
    d_k = input_dim // n_heads
    d_v = d_k
    # The in-kernel handling of context.transpose(1,2).reshape needs N | D.
    # TODO(synk): add a general fallback path for input_dim % N != 0.
    assert input_dim % N == 0, "fused kernel requires N to divide input_dim"
    g = input_dim // N

    WQ, WK, WV = params["W_Q"], params["W_K"], params["W_V"]
    Wfc, Wl1, bl1 = params["fc"], params["l1_w"], params["l1_b"]
    out_dim = Wl1.shape[0]

    # One-off host-side weight preprocessing (free when weights are reused).
    scale = jnp.float32(1.0 / np.sqrt(d_k))
    wqkv = jnp.concatenate([WQ * scale, WK, WV], axis=0)       # (3*D, D)
    wct = (Wl1 @ Wfc).T.astype(jnp.float32)                    # (D, O)
    bias = bl1.reshape(1, out_dim).astype(jnp.float32)         # (1, O)

    full = lambda shape: pl.BlockSpec(shape, lambda i: (0,) * len(shape))
    kernel = functools.partial(_fused_mha_kernel, n_heads, d_k, d_v, g)

    return pl.pallas_call(
        kernel,
        out_shape=jax.ShapeDtypeStruct((N, out_dim), jnp.float32),
        grid=(1,),
        in_specs=[
            full((N, input_dim)),
            full((3 * input_dim, input_dim)),
            full((input_dim, out_dim)),
            full((1, out_dim)),
        ],
        out_specs=full((N, out_dim)),
        scratch_shapes=[pltpu.VMEM((input_dim, N), jnp.float32)],
        compiler_params=pltpu.CompilerParams(
            dimension_semantics=("arbitrary",)),
    )(x, wqkv, wct, bias)


def mha_reference(x, params, *, n_heads):
    """Pure-JAX mirror of MultiHeadAttention.forward (PyTorch)."""
    N, input_dim = x.shape
    d_k = input_dim // n_heads
    d_v = d_k
    Q = (x @ params["W_Q"].T).reshape(-1, n_heads, d_k).transpose(1, 0, 2)
    K = (x @ params["W_K"].T).reshape(-1, n_heads, d_k).transpose(1, 0, 2)
    V = (x @ params["W_V"].T).reshape(-1, n_heads, d_v).transpose(1, 0, 2)
    scores = jnp.einsum("hnd,hmd->hnm", Q, K) / np.sqrt(d_k)
    attn = jax.nn.softmax(scores, axis=-1)
    context = jnp.einsum("hnm,hmd->hnd", attn, V)
    context = jnp.reshape(jnp.transpose(context, (0, 2, 1)), (-1, n_heads * d_v))
    out = context @ params["fc"].T
    return out @ params["l1_w"].T + params["l1_b"]


# ---------------------------------------------------------------------------
# Kernel 2: FpgnnModel fusion head
#   h   = sum_i relu(x_i @ W_i.T + b_i)           (four encoder FCs)
#   y   = relu(h @ Wf1.T + bf1)
#   out = y @ Wf2.T + bf2      (+ sigmoid if is_classif, eval mode)
# ---------------------------------------------------------------------------
def _fusion_head_kernel(is_classif,
                        x1_ref, x2_ref, x3_ref, x4_ref,
                        w1_ref, b1_ref, w2_ref, b2_ref,
                        w3_ref, b3_ref, w4_ref, b4_ref,
                        wf1_ref, bf1_ref, wf2_ref, bf2_ref,
                        o_ref):
    def proj_relu(x_ref, w_ref, b_ref):
        p = _dot_nt(x_ref[...], w_ref[...]) + b_ref[...]
        return jnp.maximum(p, 0.0)

    # Dropout layers are eval-mode identities here.
    h = (proj_relu(x1_ref, w1_ref, b1_ref)
         + proj_relu(x2_ref, w2_ref, b2_ref)
         + proj_relu(x3_ref, w3_ref, b3_ref)
         + proj_relu(x4_ref, w4_ref, b4_ref))                 # (B, L)

    y = jnp.maximum(_dot_nt(h, wf1_ref[...]) + bf1_ref[...], 0.0)
    out = _dot_nt(y, wf2_ref[...]) + bf2_ref[...]
    if is_classif:
        out = 1.0 / (1.0 + jnp.exp(-out))
    o_ref[...] = out


def fpgnn_fusion_head(fpn_out, gcn_out, egnn_out, image_out, params,
                      *, is_classif):
    B = fpn_out.shape[0]
    task_num = params["ffn_w2"].shape[0]
    f32 = lambda a: jnp.asarray(a, jnp.float32)
    row = lambda b: jnp.asarray(b, jnp.float32).reshape(1, -1)

    operands = [
        f32(fpn_out), f32(gcn_out), f32(egnn_out), f32(image_out),
        f32(params["w_fpn"]), row(params["b_fpn"]),
        f32(params["w_gcn"]), row(params["b_gcn"]),
        f32(params["w_egnn"]), row(params["b_egnn"]),
        f32(params["w_img"]), row(params["b_img"]),
        f32(params["ffn_w1"]), row(params["ffn_b1"]),
        f32(params["ffn_w2"]), row(params["ffn_b2"]),
    ]
    full = lambda shape: pl.BlockSpec(shape, lambda i: (0,) * len(shape))

    return pl.pallas_call(
        functools.partial(_fusion_head_kernel, is_classif),
        out_shape=jax.ShapeDtypeStruct((B, task_num), jnp.float32),
        grid=(1,),
        in_specs=[full(op.shape) for op in operands],
        out_specs=full((B, task_num)),
        compiler_params=pltpu.CompilerParams(
            dimension_semantics=("arbitrary",)),
    )(*operands)


def fusion_head_reference(fpn_out, gcn_out, egnn_out, image_out, params,
                          *, is_classif):
    """Pure-JAX mirror of FpgnnModel.forward after the encoders (eval mode)."""
    def proj(x, w, b):
        return jnp.maximum(x @ w.T + b, 0.0)

    h = (proj(fpn_out, params["w_fpn"], params["b_fpn"])
         + proj(gcn_out, params["w_gcn"], params["b_gcn"])
         + proj(egnn_out, params["w_egnn"], params["b_egnn"])
         + proj(image_out, params["w_img"], params["b_img"]))
    y = jnp.maximum(h @ params["ffn_w1"].T + params["ffn_b1"], 0.0)
    out = y @ params["ffn_w2"].T + params["ffn_b2"]
    if is_classif:
        out = 1.0 / (1.0 + jnp.exp(-out))
    return out


if __name__ == "__main__":
    key = jax.random.PRNGKey(0)
    ks = jax.random.split(key, 24)

    # ---------------- Part 1: MultiHeadAttention block ----------------------
    N, input_dim, out_dim = 8, 32, 16
    d_model = input_dim  # H * d_k == input_dim for every head count
    mha_params = {
        "W_Q": jax.random.normal(ks[0], (d_model, input_dim), jnp.float32) * 0.1,
        "W_K": jax.random.normal(ks[1], (d_model, input_dim), jnp.float32) * 0.1,
        "W_V": jax.random.normal(ks[2], (d_model, input_dim), jnp.float32) * 0.1,
        "fc":  jax.random.normal(ks[3], (input_dim, d_model), jnp.float32) * 0.1,
        "l1_w": jax.random.normal(ks[4], (out_dim, input_dim), jnp.float32) * 0.1,
        "l1_b": jax.random.normal(ks[5], (out_dim,), jnp.float32) * 0.1,
    }
    x = jax.random.normal(ks[6], (N, input_dim), jnp.float32)

    # n_heads=1 is what FpgnnModel uses; n_heads=4 exercises the multi-head
    # path.  Tolerance reflects the approximate EUP reciprocal in the softmax
    # denominator and the host-side fc/l1 weight merge.
    for n_heads in (1, 4):
        out = jax.block_until_ready(
            multi_head_attention(x, mha_params, n_heads=n_heads))
        ref = mha_reference(x, mha_params, n_heads=n_heads)
        np.testing.assert_allclose(np.asarray(out), np.asarray(ref),
                                   rtol=2e-3, atol=2e-3)

    # ---------------- Part 2: FpgnnModel fusion head -------------------------
    B = 8                       # batch of molecules
    fpn_dim, gnn_dim, egnn_dim = 32, 24, 16   # hidden_size, hidden_gnn, emb_egnn
    linear_dim, task_num = 16, 8

    fpn_out = jax.random.normal(ks[7], (B, fpn_dim), jnp.float32)
    gcn_out = jax.random.normal(ks[8], (B, gnn_dim), jnp.float32)
    egnn_out = jax.random.normal(ks[9], (B, egnn_dim), jnp.float32)
    image_out = jax.random.normal(ks[10], (B, linear_dim), jnp.float32)

    head_params = {
        "w_fpn": jax.random.normal(ks[11], (linear_dim, fpn_dim), jnp.float32) * 0.1,
        "b_fpn": jax.random.normal(ks[12], (linear_dim,), jnp.float32) * 0.1,
        "w_gcn": jax.random.normal(ks[13], (linear_dim, gnn_dim), jnp.float32) * 0.1,
        "b_gcn": jax.random.normal(ks[14], (linear_dim,), jnp.float32) * 0.1,
        "w_egnn": jax.random.normal(ks[15], (linear_dim, egnn_dim), jnp.float32) * 0.1,
        "b_egnn": jax.random.normal(ks[16], (linear_dim,), jnp.float32) * 0.1,
        "w_img": jax.random.normal(ks[17], (linear_dim, linear_dim), jnp.float32) * 0.1,
        "b_img": jax.random.normal(ks[18], (linear_dim,), jnp.float32) * 0.1,
        "ffn_w1": jax.random.normal(ks[19], (linear_dim, linear_dim), jnp.float32) * 0.1,
        "ffn_b1": jax.random.normal(ks[20], (linear_dim,), jnp.float32) * 0.1,
        "ffn_w2": jax.random.normal(ks[21], (task_num, linear_dim), jnp.float32) * 0.1,
        "ffn_b2": jax.random.normal(ks[22], (task_num,), jnp.float32) * 0.1,
    }

    for is_classif in (True, False):
        out = jax.block_until_ready(
            fpgnn_fusion_head(fpn_out, gcn_out, egnn_out, image_out,
                              head_params, is_classif=is_classif))
        ref = fusion_head_reference(fpn_out, gcn_out, egnn_out, image_out,
                                    head_params, is_classif=is_classif)
        np.testing.assert_allclose(np.asarray(out), np.asarray(ref),
                                   rtol=2e-3, atol=2e-3)

    print("KERNEL_OK")
</pallas_src>

<mosaic_0001>
module attributes {stable_mosaic.version = 11 : i64} {
  func.func @_fused_mha_kernel(%arg0: i32, %arg1: memref<8x32xf32, #tpu.memory_space<vmem>>, %arg2: memref<96x32xf32, #tpu.memory_space<vmem>>, %arg3: memref<32x16xf32, #tpu.memory_space<vmem>>, %arg4: memref<1x16xf32, #tpu.memory_space<vmem>>, %arg5: memref<8x16xf32, #tpu.memory_space<vmem>>, %arg6: memref<32x8xf32, #tpu.memory_space<vmem>>) attributes {dimension_semantics = [#tpu.dimension_semantics<arbitrary>], iteration_bounds = array<i64: 1>, scalar_prefetch = 0 : i64, scratch_operands = 1 : i64, tpu.core_type = #tpu.core_type<tc>, window_params = [{pipeline_mode = #tpu.pipeline_mode<synchronous>, transform_indices = @transform_0, window_bounds = array<i64: 8, 32>}, {pipeline_mode = #tpu.pipeline_mode<synchronous>, transform_indices = @transform_1, window_bounds = array<i64: 96, 32>}, {pipeline_mode = #tpu.pipeline_mode<synchronous>, transform_indices = @transform_2, window_bounds = array<i64: 32, 16>}, {pipeline_mode = #tpu.pipeline_mode<synchronous>, transform_indices = @transform_3, window_bounds = array<i64: 1, 16>}, {pipeline_mode = #tpu.pipeline_mode<synchronous>, transform_indices = @transform_4, window_bounds = array<i64: 8, 16>}]} {
    %c0 = arith.constant 0 : index
    %c0_0 = arith.constant 0 : index
    %0 = vector.load %arg1[%c0, %c0_0] : memref<8x32xf32, #tpu.memory_space<vmem>>, vector<8x32xf32>
    %c0_1 = arith.constant 0 : index
    %c0_2 = arith.constant 0 : index
    %1 = vector.load %arg2[%c0_1, %c0_2] : memref<96x32xf32, #tpu.memory_space<vmem>>, vector<96x32xf32>
    %cst = arith.constant dense<0.000000e+00> : vector<8x96xf32>
    %2 = tpu.matmul %0, %1, %cst {dimension_numbers = #tpu.dot_dimension_numbers<[1], [1], [0], [0], [0, 0, 1, 0], [], []>} : vector<8x32xf32>, vector<96x32xf32>, vector<8x96xf32> -> vector<8x96xf32>
    %3 = vector.extract_strided_slice %2 {offsets = [0, 0], sizes = [8, 32], strides = [1, 1]} : vector<8x96xf32> to vector<8x32xf32>
    %4 = vector.extract_strided_slice %2 {offsets = [0, 32], sizes = [8, 32], strides = [1, 1]} : vector<8x96xf32> to vector<8x32xf32>
    %5 = vector.extract_strided_slice %2 {offsets = [0, 64], sizes = [8, 32], strides = [1, 1]} : vector<8x96xf32> to vector<8x32xf32>
    %cst_3 = arith.constant dense<0.000000e+00> : vector<8x8xf32>
    %6 = tpu.matmul %3, %4, %cst_3 {dimension_numbers = #tpu.dot_dimension_numbers<[1], [1], [0], [0], [0, 0, 1, 0], [], []>} : vector<8x32xf32>, vector<8x32xf32>, vector<8x8xf32> -> vector<8x8xf32>
    %cst_4 = arith.constant dense<0xFF800000> : vector<8xf32>
    %7 = vector.multi_reduction <maximumf>, %6, %cst_4 [1] : vector<8x8xf32> to vector<8xf32>
    %8 = vector.shape_cast %7 : vector<8xf32> to vector<8x1xf32>
    %9 = vector.broadcast %8 : vector<8x1xf32> to vector<8x8xf32>
    %10 = arith.subf %6, %9 : vector<8x8xf32>
    %11 = math.exp %10 : vector<8x8xf32>
    %cst_5 = arith.constant dense<0.000000e+00> : vector<8xf32>
    %12 = vector.multi_reduction <add>, %11, %cst_5 [1] : vector<8x8xf32> to vector<8xf32>
    %13 = vector.shape_cast %12 : vector<8xf32> to vector<8x1xf32>
    %14 = tpu.reciprocal %13 {approx = true} : vector<8x1xf32> -> vector<8x1xf32>
    %15 = vector.broadcast %14 : vector<8x1xf32> to vector<8x8xf32>
    %16 = arith.mulf %11, %15 : vector<8x8xf32>
    %cst_6 = arith.constant dense<0.000000e+00> : vector<8x32xf32>
    %17 = tpu.matmul %16, %5, %cst_6 {dimension_numbers = #tpu.dot_dimension_numbers<[1], [0], [0], [1], [0, 0, 1, 1], [], []>} : vector<8x8xf32>, vector<8x32xf32>, vector<8x32xf32> -> vector<8x32xf32>
    %18 = tpu.transpose %17, [1, 0] : vector<8x32xf32> -> vector<32x8xf32>
    %19 = vector.extract_strided_slice %18 {offsets = [0, 0], sizes = [1, 8], strides = [1, 1]} : vector<32x8xf32> to vector<1x8xf32>
    %c0_7 = arith.constant 0 : index
    %c0_8 = arith.constant 0 : index
    %20 = vector.load %arg6[%c0_7, %c0_8] : memref<32x8xf32, #tpu.memory_space<vmem>>, vector<1x8xf32>
    tpu.vector_store %arg6[%c0_7, %c0_8], %19 {strides = array<i32>} : memref<32x8xf32, #tpu.memory_space<vmem>>, vector<1x8xf32>,
    %21 = vector.extract_strided_slice %18 {offsets = [1, 0], sizes = [1, 8], strides = [1, 1]} : vector<32x8xf32> to vector<1x8xf32>
    %c8 = arith.constant 8 : index
    %c0_9 = arith.constant 0 : index
    %22 = vector.load %arg6[%c8, %c0_9] : memref<32x8xf32, #tpu.memory_space<vmem>>, vector<1x8xf32>
    tpu.vector_store %arg6[%c8, %c0_9], %21 {strides = array<i32>} : memref<32x8xf32, #tpu.memory_space<vmem>>, vector<1x8xf32>,
    %23 = vector.extract_strided_slice %18 {offsets = [2, 0], sizes = [1, 8], strides = [1, 1]} : vector<32x8xf32> to vector<1x8xf32>
    %c16 = arith.constant 16 : index
    %c0_10 = arith.constant 0 : index
    %24 = vector.load %arg6[%c16, %c0_10] : memref<32x8xf32, #tpu.memory_space<vmem>>, vector<1x8xf32>
    tpu.vector_store %arg6[%c16, %c0_10], %23 {strides = array<i32>} : memref<32x8xf32, #tpu.memory_space<vmem>>, vector<1x8xf32>,
    %25 = vector.extract_strided_slice %18 {offsets = [3, 0], sizes = [1, 8], strides = [1, 1]} : vector<32x8xf32> to vector<1x8xf32>
    %c24 = arith.constant 24 : index
    %c0_11 = arith.constant 0 : index
    %26 = vector.load %arg6[%c24, %c0_11] : memref<32x8xf32, #tpu.memory_space<vmem>>, vector<1x8xf32>
    tpu.vector_store %arg6[%c24, %c0_11], %25 {strides = array<i32>} : memref<32x8xf32, #tpu.memory_space<vmem>>, vector<1x8xf32>,
    %27 = vector.extract_strided_slice %18 {offsets = [4, 0], sizes = [1, 8], strides = [1, 1]} : vector<32x8xf32> to vector<1x8xf32>
    %c1 = arith.constant 1 : index
    %c0_12 = arith.constant 0 : index
    %28 = vector.load %arg6[%c1, %c0_12] : memref<32x8xf32, #tpu.memory_space<vmem>>, vector<1x8xf32>
    tpu.vector_store %arg6[%c1, %c0_12], %27 {strides = array<i32>} : memref<32x8xf32, #tpu.memory_space<vmem>>, vector<1x8xf32>,
    %29 = vector.extract_strided_slice %18 {offsets = [5, 0], sizes = [1, 8], strides = [1, 1]} : vector<32x8xf32> to vector<1x8xf32>
    %c9 = arith.constant 9 : index
    %c0_13 = arith.constant 0 : index
    %30 = vector.load %arg6[%c9, %c0_13] : memref<32x8xf32, #tpu.memory_space<vmem>>, vector<1x8xf32>
    tpu.vector_store %arg6[%c9, %c0_13], %29 {strides = array<i32>} : memref<32x8xf32, #tpu.memory_space<vmem>>, vector<1x8xf32>,
    %31 = vector.extract_strided_slice %18 {offsets = [6, 0], sizes = [1, 8], strides = [1, 1]} : vector<32x8xf32> to vector<1x8xf32>
    %c17 = arith.constant 17 : index
    %c0_14 = arith.constant 0 : index
    %32 = vector.load %arg6[%c17, %c0_14] : memref<32x8xf32, #tpu.memory_space<vmem>>, vector<1x8xf32>
    tpu.vector_store %arg6[%c17, %c0_14], %31 {strides = array<i32>} : memref<32x8xf32, #tpu.memory_space<vmem>>, vector<1x8xf32>,
    %33 = vector.extract_strided_slice %18 {offsets = [7, 0], sizes = [1, 8], strides = [1, 1]} : vector<32x8xf32> to vector<1x8xf32>
    %c25 = arith.constant 25 : index
    %c0_15 = arith.constant 0 : index
    %34 = vector.load %arg6[%c25, %c0_15] : memref<32x8xf32, #tpu.memory_space<vmem>>, vector<1x8xf32>
    tpu.vector_store %arg6[%c25, %c0_15], %33 {strides = array<i32>} : memref<32x8xf32, #tpu.memory_space<vmem>>, vector<1x8xf32>,
    %35 = vector.extract_strided_slice %18 {offsets = [8, 0], sizes = [1, 8], strides = [1, 1]} : vector<32x8xf32> to vector<1x8xf32>
    %c2 = arith.constant 2 : index
    %c0_16 = arith.constant 0 : index
    %36 = vector.load %arg6[%c2, %c0_16] : memref<32x8xf32, #tpu.memory_space<vmem>>, vector<1x8xf32>
    tpu.vector_store %arg6[%c2, %c0_16], %35 {strides = array<i32>} : memref<32x8xf32, #tpu.memory_space<vmem>>, vector<1x8xf32>,
    %37 = vector.extract_strided_slice %18 {offsets = [9, 0], sizes = [1, 8], strides = [1, 1]} : vector<32x8xf32> to vector<1x8xf32>
    %c10 = arith.constant 10 : index
    %c0_17 = arith.constant 0 : index
    %38 = vector.load %arg6[%c10, %c0_17] : memref<32x8xf32, #tpu.memory_space<vmem>>, vector<1x8xf32>
    tpu.vector_store %arg6[%c10, %c0_17], %37 {strides = array<i32>} : memref<32x8xf32, #tpu.memory_space<vmem>>, vector<1x8xf32>,
    %39 = vector.extract_strided_slice %18 {offsets = [10, 0], sizes = [1, 8], strides = [1, 1]} : vector<32x8xf32> to vector<1x8xf32>
    %c18 = arith.constant 18 : index
    %c0_18 = arith.constant 0 : index
    %40 = vector.load %arg6[%c18, %c0_18] : memref<32x8xf32, #tpu.memory_space<vmem>>, vector<1x8xf32>
    tpu.vector_store %arg6[%c18, %c0_18], %39 {strides = array<i32>} : memref<32x8xf32, #tpu.memory_space<vmem>>, vector<1x8xf32>,
    %41 = vector.extract_strided_slice %18 {offsets = [11, 0], sizes = [1, 8], strides = [1, 1]} : vector<32x8xf32> to vector<1x8xf32>
    %c26 = arith.constant 26 : index
    %c0_19 = arith.constant 0 : index
    %42 = vector.load %arg6[%c26, %c0_19] : memref<32x8xf32, #tpu.memory_space<vmem>>, vector<1x8xf32>
    tpu.vector_store %arg6[%c26, %c0_19], %41 {strides = array<i32>} : memref<32x8xf32, #tpu.memory_space<vmem>>, vector<1x8xf32>,
    %43 = vector.extract_strided_slice %18 {offsets = [12, 0], sizes = [1, 8], strides = [1, 1]} : vector<32x8xf32> to vector<1x8xf32>
    %c3 = arith.constant 3 : index
    %c0_20 = arith.constant 0 : index
    %44 = vector.load %arg6[%c3, %c0_20] : memref<32x8xf32, #tpu.memory_space<vmem>>, vector<1x8xf32>
    tpu.vector_store %arg6[%c3, %c0_20], %43 {strides = array<i32>} : memref<32x8xf32, #tpu.memory_space<vmem>>, vector<1x8xf32>,
    %45 = vector.extract_strided_slice %18 {offsets = [13, 0], sizes = [1, 8], strides = [1, 1]} : vector<32x8xf32> to vector<1x8xf32>
    %c11 = arith.constant 11 : index
    %c0_21 = arith.constant 0 : index
    %46 = vector.load %arg6[%c11, %c0_21] : memref<32x8xf32, #tpu.memory_space<vmem>>, vector<1x8xf32>
    tpu.vector_store %arg6[%c11, %c0_21], %45 {strides = array<i32>} : memref<32x8xf32, #tpu.memory_space<vmem>>, vector<1x8xf32>,
    %47 = vector.extract_strided_slice %18 {offsets = [14, 0], sizes = [1, 8], strides = [1, 1]} : vector<32x8xf32> to vector<1x8xf32>
    %c19 = arith.constant 19 : index
    %c0_22 = arith.constant 0 : index
    %48 = vector.load %arg6[%c19, %c0_22] : memref<32x8xf32, #tpu.memory_space<vmem>>, vector<1x8xf32>
    tpu.vector_store %arg6[%c19, %c0_22], %47 {strides = array<i32>} : memref<32x8xf32, #tpu.memory_space<vmem>>, vector<1x8xf32>,
    %49 = vector.extract_strided_slice %18 {offsets = [15, 0], sizes = [1, 8], strides = [1, 1]} : vector<32x8xf32> to vector<1x8xf32>
    %c27 = arith.constant 27 : index
    %c0_23 = arith.constant 0 : index
    %50 = vector.load %arg6[%c27, %c0_23] : memref<32x8xf32, #tpu.memory_space<vmem>>, vector<1x8xf32>
    tpu.vector_store %arg6[%c27, %c0_23], %49 {strides = array<i32>} : memref<32x8xf32, #tpu.memory_space<vmem>>, vector<1x8xf32>,
    %51 = vector.extract_strided_slice %18 {offsets = [16, 0], sizes = [1, 8], strides = [1, 1]} : vector<32x8xf32> to vector<1x8xf32>
    %c4 = arith.constant 4 : index
    %c0_24 = arith.constant 0 : index
    %52 = vector.load %arg6[%c4, %c0_24] : memref<32x8xf32, #tpu.memory_space<vmem>>, vector<1x8xf32>
    tpu.vector_store %arg6[%c4, %c0_24], %51 {strides = array<i32>} : memref<32x8xf32, #tpu.memory_space<vmem>>, vector<1x8xf32>,
    %53 = vector.extract_strided_slice %18 {offsets = [17, 0], sizes = [1, 8], strides = [1, 1]} : vector<32x8xf32> to vector<1x8xf32>
    %c12 = arith.constant 12 : index
    %c0_25 = arith.constant 0 : index
    %54 = vector.load %arg6[%c12, %c0_25] : memref<32x8xf32, #tpu.memory_space<vmem>>, vector<1x8xf32>
    tpu.vector_store %arg6[%c12, %c0_25], %53 {strides = array<i32>} : memref<32x8xf32, #tpu.memory_space<vmem>>, vector<1x8xf32>,
    %55 = vector.extract_strided_slice %18 {offsets = [18, 0], sizes = [1, 8], strides = [1, 1]} : vector<32x8xf32> to vector<1x8xf32>
    %c20 = arith.constant 20 : index
    %c0_26 = arith.constant 0 : index
    %56 = vector.load %arg6[%c20, %c0_26] : memref<32x8xf32, #tpu.memory_space<vmem>>, vector<1x8xf32>
    tpu.vector_store %arg6[%c20, %c0_26], %55 {strides = array<i32>} : memref<32x8xf32, #tpu.memory_space<vmem>>, vector<1x8xf32>,
    %57 = vector.extract_strided_slice %18 {offsets = [19, 0], sizes = [1, 8], strides = [1, 1]} : vector<32x8xf32> to vector<1x8xf32>
    %c28 = arith.constant 28 : index
    %c0_27 = arith.constant 0 : index
    %58 = vector.load %arg6[%c28, %c0_27] : memref<32x8xf32, #tpu.memory_space<vmem>>, vector<1x8xf32>
    tpu.vector_store %arg6[%c28, %c0_27], %57 {strides = array<i32>} : memref<32x8xf32, #tpu.memory_space<vmem>>, vector<1x8xf32>,
    %59 = vector.extract_strided_slice %18 {offsets = [20, 0], sizes = [1, 8], strides = [1, 1]} : vector<32x8xf32> to vector<1x8xf32>
    %c5 = arith.constant 5 : index
    %c0_28 = arith.constant 0 : index
    %60 = vector.load %arg6[%c5, %c0_28] : memref<32x8xf32, #tpu.memory_space<vmem>>, vector<1x8xf32>
    tpu.vector_store %arg6[%c5, %c0_28], %59 {strides = array<i32>} : memref<32x8xf32, #tpu.memory_space<vmem>>, vector<1x8xf32>,
    %61 = vector.extract_strided_slice %18 {offsets = [21, 0], sizes = [1, 8], strides = [1, 1]} : vector<32x8xf32> to vector<1x8xf32>
    %c13 = arith.constant 13 : index
    %c0_29 = arith.constant 0 : index
    %62 = vector.load %arg6[%c13, %c0_29] : memref<32x8xf32, #tpu.memory_space<vmem>>, vector<1x8xf32>
    tpu.vector_store %arg6[%c13, %c0_29], %61 {strides = array<i32>} : memref<32x8xf32, #tpu.memory_space<vmem>>, vector<1x8xf32>,
    %63 = vector.extract_strided_slice %18 {offsets = [22, 0], sizes = [1, 8], strides = [1, 1]} : vector<32x8xf32> to vector<1x8xf32>
    %c21 = arith.constant 21 : index
    %c0_30 = arith.constant 0 : index
    %64 = vector.load %arg6[%c21, %c0_30] : memref<32x8xf32, #tpu.memory_space<vmem>>, vector<1x8xf32>
    tpu.vector_store %arg6[%c21, %c0_30], %63 {strides = array<i32>} : memref<32x8xf32, #tpu.memory_space<vmem>>, vector<1x8xf32>,
    %65 = vector.extract_strided_slice %18 {offsets = [23, 0], sizes = [1, 8], strides = [1, 1]} : vector<32x8xf32> to vector<1x8xf32>
    %c29 = arith.constant 29 : index
    %c0_31 = arith.constant 0 : index
    %66 = vector.load %arg6[%c29, %c0_31] : memref<32x8xf32, #tpu.memory_space<vmem>>, vector<1x8xf32>
    tpu.vector_store %arg6[%c29, %c0_31], %65 {strides = array<i32>} : memref<32x8xf32, #tpu.memory_space<vmem>>, vector<1x8xf32>,
    %67 = vector.extract_strided_slice %18 {offsets = [24, 0], sizes = [1, 8], strides = [1, 1]} : vector<32x8xf32> to vector<1x8xf32>
    %c6 = arith.constant 6 : index
    %c0_32 = arith.constant 0 : index
    %68 = vector.load %arg6[%c6, %c0_32] : memref<32x8xf32, #tpu.memory_space<vmem>>, vector<1x8xf32>
    tpu.vector_store %arg6[%c6, %c0_32], %67 {strides = array<i32>} : memref<32x8xf32, #tpu.memory_space<vmem>>, vector<1x8xf32>,
    %69 = vector.extract_strided_slice %18 {offsets = [25, 0], sizes = [1, 8], strides = [1, 1]} : vector<32x8xf32> to vector<1x8xf32>
    %c14 = arith.constant 14 : index
    %c0_33 = arith.constant 0 : index
    %70 = vector.load %arg6[%c14, %c0_33] : memref<32x8xf32, #tpu.memory_space<vmem>>, vector<1x8xf32>
    tpu.vector_store %arg6[%c14, %c0_33], %69 {strides = array<i32>} : memref<32x8xf32, #tpu.memory_space<vmem>>, vector<1x8xf32>,
    %71 = vector.extract_strided_slice %18 {offsets = [26, 0], sizes = [1, 8], strides = [1, 1]} : vector<32x8xf32> to vector<1x8xf32>
    %c22 = arith.constant 22 : index
    %c0_34 = arith.constant 0 : index
    %72 = vector.load %arg6[%c22, %c0_34] : memref<32x8xf32, #tpu.memory_space<vmem>>, vector<1x8xf32>
    tpu.vector_store %arg6[%c22, %c0_34], %71 {strides = array<i32>} : memref<32x8xf32, #tpu.memory_space<vmem>>, vector<1x8xf32>,
    %73 = vector.extract_strided_slice %18 {offsets = [27, 0], sizes = [1, 8], strides = [1, 1]} : vector<32x8xf32> to vector<1x8xf32>
    %c30 = arith.constant 30 : index
    %c0_35 = arith.constant 0 : index
    %74 = vector.load %arg6[%c30, %c0_35] : memref<32x8xf32, #tpu.memory_space<vmem>>, vector<1x8xf32>
    tpu.vector_store %arg6[%c30, %c0_35], %73 {strides = array<i32>} : memref<32x8xf32, #tpu.memory_space<vmem>>, vector<1x8xf32>,
    %75 = vector.extract_strided_slice %18 {offsets = [28, 0], sizes = [1, 8], strides = [1, 1]} : vector<32x8xf32> to vector<1x8xf32>
    %c7 = arith.constant 7 : index
    %c0_36 = arith.constant 0 : index
    %76 = vector.load %arg6[%c7, %c0_36] : memref<32x8xf32, #tpu.memory_space<vmem>>, vector<1x8xf32>
    tpu.vector_store %arg6[%c7, %c0_36], %75 {strides = array<i32>} : memref<32x8xf32, #tpu.memory_space<vmem>>, vector<1x8xf32>,
    %77 = vector.extract_strided_slice %18 {offsets = [29, 0], sizes = [1, 8], strides = [1, 1]} : vector<32x8xf32> to vector<1x8xf32>
    %c15 = arith.constant 15 : index
    %c0_37 = arith.constant 0 : index
    %78 = vector.load %arg6[%c15, %c0_37] : memref<32x8xf32, #tpu.memory_space<vmem>>, vector<1x8xf32>
    tpu.vector_store %arg6[%c15, %c0_37], %77 {strides = array<i32>} : memref<32x8xf32, #tpu.memory_space<vmem>>, vector<1x8xf32>,
    %79 = vector.extract_strided_slice %18 {offsets = [30, 0], sizes = [1, 8], strides = [1, 1]} : vector<32x8xf32> to vector<1x8xf32>
    %c23 = arith.constant 23 : index
    %c0_38 = arith.constant 0 : index
    %80 = vector.load %arg6[%c23, %c0_38] : memref<32x8xf32, #tpu.memory_space<vmem>>, vector<1x8xf32>
    tpu.vector_store %arg6[%c23, %c0_38], %79 {strides = array<i32>} : memref<32x8xf32, #tpu.memory_space<vmem>>, vector<1x8xf32>,
    %81 = vector.extract_strided_slice %18 {offsets = [31, 0], sizes = [1, 8], strides = [1, 1]} : vector<32x8xf32> to vector<1x8xf32>
    %c31 = arith.constant 31 : index
    %c0_39 = arith.constant 0 : index
    %82 = vector.load %arg6[%c31, %c0_39] : memref<32x8xf32, #tpu.memory_space<vmem>>, vector<1x8xf32>
    tpu.vector_store %arg6[%c31, %c0_39], %81 {strides = array<i32>} : memref<32x8xf32, #tpu.memory_space<vmem>>, vector<1x8xf32>,
    %c0_40 = arith.constant 0 : index
    %c0_41 = arith.constant 0 : index
    %83 = vector.load %arg6[%c0_40, %c0_41] : memref<32x8xf32, #tpu.memory_space<vmem>>, vector<8x8xf32>
    %c0_42 = arith.constant 0 : index
    %c0_43 = arith.constant 0 : index
    %84 = vector.load %arg3[%c0_42, %c0_43] : memref<32x16xf32, #tpu.memory_space<vmem>>, vector<8x16xf32>
    %cst_44 = arith.constant dense<0.000000e+00> : vector<8x16xf32>
    %85 = tpu.matmul %83, %84, %cst_44 {dimension_numbers = #tpu.dot_dimension_numbers<[1], [0], [0], [1], [0, 0, 1, 1], [], []>} : vector<8x8xf32>, vector<8x16xf32>, vector<8x16xf32> -> vector<8x16xf32>
    %c8_45 = arith.constant 8 : index
    %c0_46 = arith.constant 0 : index
    %86 = vector.load %arg6[%c8_45, %c0_46] : memref<32x8xf32, #tpu.memory_space<vmem>>, vector<8x8xf32>
    %c8_47 = arith.constant 8 : index
    %c0_48 = arith.constant 0 : index
    %87 = vector.load %arg3[%c8_47, %c0_48] : memref<32x16xf32, #tpu.memory_space<vmem>>, vector<8x16xf32>
    %cst_49 = arith.constant dense<0.000000e+00> : vector<8x16xf32>
    %88 = tpu.matmul %86, %87, %cst_49 {dimension_numbers = #tpu.dot_dimension_numbers<[1], [0], [0], [1], [0, 0, 1, 1], [], []>} : vector<8x8xf32>, vector<8x16xf32>, vector<8x16xf32> -> vector<8x16xf32>
    %89 = arith.addf %85, %88 : vector<8x16xf32>
    %c16_50 = arith.constant 16 : index
    %c0_51 = arith.constant 0 : index
    %90 = vector.load %arg6[%c16_50, %c0_51] : memref<32x8xf32, #tpu.memory_space<vmem>>, vector<8x8xf32>
    %c16_52 = arith.constant 16 : index
    %c0_53 = arith.constant 0 : index
    %91 = vector.load %arg3[%c16_52, %c0_53] : memref<32x16xf32, #tpu.memory_space<vmem>>, vector<8x16xf32>
    %cst_54 = arith.constant dense<0.000000e+00> : vector<8x16xf32>
    %92 = tpu.matmul %90, %91, %cst_54 {dimension_numbers = #tpu.dot_dimension_numbers<[1], [0], [0], [1], [0, 0, 1, 1], [], []>} : vector<8x8xf32>, vector<8x16xf32>, vector<8x16xf32> -> vector<8x16xf32>
    %93 = arith.addf %89, %92 : vector<8x16xf32>
    %c24_55 = arith.constant 24 : index
    %c0_56 = arith.constant 0 : index
    %94 = vector.load %arg6[%c24_55, %c0_56] : memref<32x8xf32, #tpu.memory_space<vmem>>, vector<8x8xf32>
    %c24_57 = arith.constant 24 : index
    %c0_58 = arith.constant 0 : index
    %95 = vector.load %arg3[%c24_57, %c0_58] : memref<32x16xf32, #tpu.memory_space<vmem>>, vector<8x16xf32>
    %cst_59 = arith.constant dense<0.000000e+00> : vector<8x16xf32>
    %96 = tpu.matmul %94, %95, %cst_59 {dimension_numbers = #tpu.dot_dimension_numbers<[1], [0], [0], [1], [0, 0, 1, 1], [], []>} : vector<8x8xf32>, vector<8x16xf32>, vector<8x16xf32> -> vector<8x16xf32>
    %97 = arith.addf %93, %96 : vector<8x16xf32>
    %c0_60 = arith.constant 0 : index
    %c0_61 = arith.constant 0 : index
    %98 = vector.load %arg4[%c0_60, %c0_61] : memref<1x16xf32, #tpu.memory_space<vmem>>, vector<1x16xf32>
    %99 = vector.broadcast %98 : vector<1x16xf32> to vector<8x16xf32>
    %100 = arith.addf %97, %99 : vector<8x16xf32>
    %c0_62 = arith.constant 0 : index
    %c0_63 = arith.constant 0 : index
    %101 = vector.load %arg5[%c0_62, %c0_63] : memref<8x16xf32, #tpu.memory_space<vmem>>, vector<8x16xf32>
    tpu.vector_store %arg5[%c0_62, %c0_63], %100 {strides = array<i32>} : memref<8x16xf32, #tpu.memory_space<vmem>>, vector<8x16xf32>,
    return
  }
  func.func @transform_0(%arg0: i32) -> (i32, i32) {
    %c0_i32 = arith.constant 0 : i32
    %c0_i32_0 = arith.constant 0 : i32
    %c0_i32_1 = arith.constant 0 : i32
    return %c0_i32, %c0_i32_0 : i32, i32
  }
  func.func @transform_1(%arg0: i32) -> (i32, i32) {
    %c0_i32 = arith.constant 0 : i32
    %c0_i32_0 = arith.constant 0 : i32
    %c0_i32_1 = arith.constant 0 : i32
    return %c0_i32, %c0_i32_0 : i32, i32
  }
  func.func @transform_2(%arg0: i32) -> (i32, i32) {
    %c0_i32 = arith.constant 0 : i32
    %c0_i32_0 = arith.constant 0 : i32
    %c0_i32_1 = arith.constant 0 : i32
    return %c0_i32, %c0_i32_0 : i32, i32
  }
  func.func @transform_3(%arg0: i32) -> (i32, i32) {
    %c0_i32 = arith.constant 0 : i32
    %c0_i32_0 = arith.constant 0 : i32
    %c0_i32_1 = arith.constant 0 : i32
    return %c0_i32, %c0_i32_0 : i32, i32
  }
  func.func @transform_4(%arg0: i32) -> (i32, i32) {
    %c0_i32 = arith.constant 0 : i32
    %c0_i32_0 = arith.constant 0 : i32
    %c0_i32_1 = arith.constant 0 : i32
    return %c0_i32, %c0_i32_0 : i32, i32
  }
}

</mosaic_0001>

<bundles_post_ra>
// kernel: tpu_custom_call.1
= control target key start
LH: loop header
LB: loop body
LE: loop exit
PB: predicated region body
PF: predicated region fallthrough
CT: control target
= control target key end

     0   :  { %vm31_vm0 = vcmask 261120   ;;  %v865_v2 = vmov 0.0|0.0   ;;  %vm866_vm2 = vmmov 0   ;;  %v867_v5 = vmov 0.0   ;;  %s1042_s0 = inlined_call_operand.vmem [shape: f32[8,32], index: 0, kind: input, shape index: {}]   ;;  %s1043_s1 = inlined_call_operand.vmem [shape: f32[96,32], index: 1, kind: input, shape index: {}]   ;;  %s1044_s2 = inlined_call_operand.vmem [shape: f32[32,16], index: 2, kind: input, shape index: {}]   ;;  %s1045_s3 = inlined_call_operand.vmem [shape: f32[1,16], index: 3, kind: input, shape index: {}]   ;;  %s1046_s4 = inlined_call_operand.hbm [shape: f32[8,16], index: 4, kind: output, shape index: {}]  }
   0x1   :  { %v19_v0 = vld [vmem:[%s1043_s1] sm:$0xff]  ;;  %v20_v1 = vld [vmem:[%s1043_s1 + $0x8] sm:$0xff]  ;;  %807 = vmatprep.subr.bf16.mxu0 %v865_v2  ;;  %vm904_vm1 = vmpackc.low %vm31_vm0, %vm31_vm0  ;;  %774 = vmatprep.mubr.msk.f32.mxu0 %vm866_vm2, %v867_v5 }
   0x2   :  { %v808_v3 = vpack.c.bf16 %v20_v1, %v19_v0  ;;  %777 = vmatprep.subr.mxu1 %v867_v5  ;;  %779 = vmatprep.mubr.msk.f32.mxu1 %vm866_vm2, %v867_v5  ;;  %v21_v6 = vld [vmem:[%s1043_s1 + $0x10] sm:$0xff]  ;;  %v22_v7 = vld [vmem:[%s1043_s1 + $0x18] sm:$0xff] }
   0x4   :  { %810 = vmatpush3.bf16.xpose.msk.msra.mxu0 %vm904_vm1, %v808_v3 }
   0x5   :  { %811 = vmatprep.subr.bf16.mxu0 %v865_v2 }
   0x6   :  { %9 = vsyncpa [#allocation4], 0  ;;  %v812_v8 = vpack.c.bf16 %v22_v7, %v21_v6  ;;  %v23_v9 = vld [vmem:[%s1043_s1 + $0x20] sm:$0xff]  ;;  %v24_v10 = vld [vmem:[%s1043_s1 + $0x28] sm:$0xff]  ;;  %s868_s15 = smov 96   ;;  %vm218_vm3 = vcmask 64512  }
   0x7   :  { %v816_v11 = vpack.c.bf16 %v24_v10, %v23_v9  ;;  %v25_v12 = vld [vmem:[%s1043_s1 + $0x30] sm:$0xff]  ;;  %v26_v13 = vld [vmem:[%s1043_s1 + $0x38] sm:$0xff]  ;;  %v27_v15 = vld [vmem:[%s1043_s1 + $0x40] sm:$0xff]  ;;  %vm338_vm4 = vcmask 57344   ;;  %vm340_vm5 = vcmask 58369   ;;  %vm342_vm6 = vcmask 59394  }
   0x8   :  { %v820_v14 = vpack.c.bf16 %v26_v13, %v25_v12  ;;  %v28_v16 = vld [vmem:[%s1043_s1 + $0x48] sm:$0xff]  ;;  %v29_v18 = vld [vmem:[%s1043_s1 + $0x50] sm:$0xff]  ;;  %v30_v19 = vld [vmem:[%s1043_s1 + $0x58] sm:$0xff]  ;;  %vm344_vm7 = vcmask 60419   ;;  %vm346_vm8 = vcmask 61444   ;;  %vm348_vm9 = vcmask 62469  }
   0x9   :  { %v824_v17 = vpack.c.bf16 %v28_v16, %v27_v15  ;;  %v828_v20 = vpack.c.bf16 %v30_v19, %v29_v18  ;;  %v18_v21 = vld [vmem:[%s1042_s0] sm:$0xff]  ;;  %s869_s0 = smov 64   ;;  %v381_v39 = vld [vmem:[%s1044_s2 + $0x8] sm:$0xff]  ;;  %vm350_vm10 = vcmask 63494   ;;  %vm352_vm11 = vcmask 64519   ;;  %v529_v46 = vld [vmem:[%s1044_s2 + $0x10] sm:$0xff] }
   0xa   :  { %v379_v44 = vld [vmem:[%s1044_s2] sm:$0xff]  ;;  %v605_v48 = vld [vmem:[%s1044_s2 + $0x18] sm:$0xff]  ;;  %s870_s24 = smov [#allocation3]   ;;  %vm688_vm12 = vcmask 130048  }
   0xb   :  { %v724_v60 = vld [vmem:[%s1045_s3] ss:$0 sm:$0xff]  ;;  %s696_s25 = sshll.u32 %s870_s24, 4  ;;  %s697_s25 = int_to_ptr.vmem [resolvable:$true] %s696_s25 }
   0xc   :  { %814 = vmatpush3.bf16.xpose.msk.msra.mxu0 %vm904_vm1, %v812_v8  ;;  %s841_s26 = scalar_lea.vmem %s697_s25, 128  ;;  %p846_p1 = scmp.lt.s32.totalorder %s697_s25, %s697_s25 }
   0xd   :  { %815 = vmatprep.subr.bf16.mxu0 %v865_v2  ;;  %p842_p0 = scmp.ne.s32.totalorder %s697_s25, %s841_s26  ;;  %p847_p2 = scmp.lt.s32.totalorder %s841_s26, %s841_s26 }
   0xf   :  { %p848_p3 = por %p847_p2, %p846_p1 }
  0x11   :  { %p849_p4 = pnand %p848_p3, %p842_p0 }
  0x14   :  { %818 = vmatpush3.bf16.xpose.msk.msra.mxu0 %vm904_vm1, %v816_v11 }
  0x15   :  { %819 = vmatprep.subr.bf16.mxu0 %v865_v2 }
  0x1c   :  { %822 = vmatpush3.bf16.xpose.msk.msra.mxu0 %vm904_vm1, %v820_v14 }
  0x1d   :  { %823 = vmatprep.subr.bf16.mxu0 %v865_v2 }
  0x24   :  { %826 = vmatpush3.bf16.xpose.msk.msra.mxu0 %vm904_vm1, %v824_v17 }
  0x25   :  { %827 = vmatprep.subr.bf16.mxu0 %v865_v2 }
  0x2c   :  { %830 = vmatpush3.bf16.xpose.msk.msra.mxu0 %vm904_vm1, %v828_v20 }
  0x33   :  { %775 = vmatmul.mubr.msk.f32.vlgmr.msra.gmra.mrb[0].mxu0 %vm31_vm0, %v18_v21 }
 0x106   :  { %v137_v22 = vpop.f32.mrb[0].mxu0 }
 0x107   :  { %142 = vrot.lane.b32.xlu0 %v137_v22, %s868_s15  ;;  %v776_v23 = vpop.f32.mrb[1].mxu0 }
 0x179   :  { %v143_v24 = vpop.permute.xlu0 %142 }
 0x17a   :  { %778 = vmatpush3.xpose.msk.msra.mxu1 %vm31_vm0, %v143_v24 }
 0x17b   :  { %782 = vmatprep.subr.mxu1 %v867_v5 }
 0x17d   :  { %780 = vmatmul.mubr.msk.f32.vlgmr.msra.gmra.mrb[0].mxu1 %vm31_vm0, %v137_v22 }
 0x17e   :  { %784 = vmatprep.mubr.msk.f32.mxu1 %vm866_vm2, %v867_v5 }
 0x250   :  { %v214_v25 = vpop.f32.mrb[0].mxu1 }
 0x251   :  { %v781_v26 = vpop.f32.mrb[1].mxu1  ;;  %v219_v27 = vsel %vm218_vm3, %v214_v25, -inf }
 0x252   :  { %220 = vmax.xlane.f32.xlu0 %v219_v27 }
 0x2df   :  { %v221_v28 = vpop.xlane.xlu0 %220 }
 0x2e0   :  { %v222_v29 = vsub.f32 %v214_v25, %v221_v28 }
 0x2e2   :  { %v223_v30 = vmul.f32 1.442695, %v222_v29 }
 0x2e4   :  { %837 = vpow2.f32 %v223_v30 }
 0x2ee   :  { %v838_v31 = vpop.eup %837 }
 0x2ef   :  { %v225_v32 = vsel %vm218_vm3, %v838_v31, 0.0 }
 0x2f0   :  { %226 = vadd.xlane.f32.xlu1 %v225_v32 }
 0x301   :  { %230 = vrot.lane.b32.xlu1 %v137_v22, %s869_s0 }
 0x37d   :  { %v227_v33 = vpop.xlane.xlu1 %226 }
 0x37e   :  { %839 = vrcp.f32 %v227_v33 }
 0x381   :  { %v231_v34 = vpop.permute.xlu1 %230 }
 0x382   :  { %783 = vmatpush3.msra.mxu1 %v231_v34 }
 0x383   :  { %787 = vmatprep.subr.mxu1 %v867_v5 }
 0x388   :  { %v840_v35 = vpop.eup %839 }
 0x389   :  { %v229_v36 = vmul.f32 %v840_v35, %v838_v31 }
 0x38b   :  { %785 = vmatmul.mubr.msk.f32.vlgmr.msra.gmra.mrb[2].mxu1 %vm218_vm3, %v229_v36 }
 0x38c   :  { %789 = vmatprep.mubr.msk.f32.mxu1 %vm866_vm2, %v867_v5  ;;  %788 = vmatpush3.msra.mxu1 %v381_v39 }
 0x38d   :  { %792 = vmatprep.subr.mxu1 %v867_v5 }
 0x45e   :  { %v302_v37 = vpop.f32.mrb[2].mxu1 }
 0x45f   :  { %306 = vxpose.xlu1.b32.start.end [1/1] (short) (narrow) %v302_v37, 32  ;;  %v786_v38 = vpop.f32.mrb[3].mxu1 }
 0x4df   :  { %v322_v40 = vpop.trf.xlu1 }
 0x4e0   :  { %339 = vst.msk [vmem:[#allocation2] sm:$0x1] %vm338_vm4, %v322_v40 }
 0x4e1   :  { %341 = vst.msk [vmem:[#allocation2 + $0x7] sm:$0x2] %vm340_vm5, %v322_v40 }
 0x4e2   :  { %343 = vst.msk [vmem:[#allocation2 + $0xe] sm:$0x4] %vm342_vm6, %v322_v40 }
 0x4e3   :  { %345 = vst.msk [vmem:[#allocation2 + $0x15] sm:$0x8] %vm344_vm7, %v322_v40  ;;  %v323_v41 = vpop.trf.xlu1 }
 0x4e4   :  { %347 = vst.msk [vmem:[#allocation2 - $0x3] sm:$0x10] %vm346_vm8, %v322_v40  ;;  %358 = vst.msk [vmem:[#allocation2 - $0x1] sm:$0x10] %vm346_vm8, %v323_v41 }
 0x4e5   :  { %349 = vst.msk [vmem:[#allocation2 + $0x4] sm:$0x20] %vm348_vm9, %v322_v40  ;;  %359 = vst.msk [vmem:[#allocation2 + $0x6] sm:$0x20] %vm348_vm9, %v323_v41 }
 0x4e6   :  { %351 = vst.msk [vmem:[#allocation2 + $0xb] sm:$0x40] %vm350_vm10, %v322_v40  ;;  %360 = vst.msk [vmem:[#allocation2 + $0xd] sm:$0x40] %vm350_vm10, %v323_v41 }
 0x4e7   :  { %353 = vst.msk [vmem:[#allocation2 + $0x12] sm:$0x80] %vm352_vm11, %v322_v40  ;;  %361 = vst.msk [vmem:[#allocation2 + $0x14] sm:$0x80] %vm352_vm11, %v323_v41  ;;  %v324_v42 = vpop.trf.xlu1 }
 0x4e8   :  { %354 = vst.msk [vmem:[#allocation2 + $0x2] sm:$0x1] %vm338_vm4, %v323_v41  ;;  %362 = vst.msk [vmem:[#allocation2 + $0x4] sm:$0x1] %vm338_vm4, %v324_v42 }
 0x4e9   :  { %355 = vst.msk [vmem:[#allocation2 + $0x9] sm:$0x2] %vm340_vm5, %v323_v41  ;;  %363 = vst.msk [vmem:[#allocation2 + $0xb] sm:$0x2] %vm340_vm5, %v324_v42 }
 0x4ea   :  { %356 = vst.msk [vmem:[#allocation2 + $0x10] sm:$0x4] %vm342_vm6, %v323_v41  ;;  %364 = vst.msk [vmem:[#allocation2 + $0x12] sm:$0x4] %vm342_vm6, %v324_v42 }
 0x4eb   :  { %357 = vst.msk [vmem:[#allocation2 + $0x17] sm:$0x8] %vm344_vm7, %v323_v41  ;;  %365 = vst.msk [vmem:[#allocation2 + $0x19] sm:$0x8] %vm344_vm7, %v324_v42  ;;  %v325_v43 = vpop.trf.xlu1 }
 0x4ec   :  { %366 = vst.msk [vmem:[#allocation2 + $0x1] sm:$0x10] %vm346_vm8, %v324_v42  ;;  %374 = vst.msk [vmem:[#allocation2 + $0x3] sm:$0x10] %vm346_vm8, %v325_v43 }
 0x4ed   :  { %367 = vst.msk [vmem:[#allocation2 + $0x8] sm:$0x20] %vm348_vm9, %v324_v42  ;;  %375 = vst.msk [vmem:[#allocation2 + $0xa] sm:$0x20] %vm348_vm9, %v325_v43 }
 0x4ee   :  { %368 = vst.msk [vmem:[#allocation2 + $0xf] sm:$0x40] %vm350_vm10, %v324_v42  ;;  %376 = vst.msk [vmem:[#allocation2 + $0x11] sm:$0x40] %vm350_vm10, %v325_v43 }
 0x4ef   :  { %369 = vst.msk [vmem:[#allocation2 + $0x16] sm:$0x80] %vm352_vm11, %v324_v42  ;;  %377 = vst.msk [vmem:[#allocation2 + $0x18] sm:$0x80] %vm352_vm11, %v325_v43 }
 0x4f0   :  { %370 = vst.msk [vmem:[#allocation2 + $0x6] sm:$0x1] %vm338_vm4, %v325_v43 }
 0x4f1   :  { %371 = vst.msk [vmem:[#allocation2 + $0xd] sm:$0x2] %vm340_vm5, %v325_v43 }
 0x4f2   :  { %372 = vst.msk [vmem:[#allocation2 + $0x14] sm:$0x4] %vm342_vm6, %v325_v43 }
 0x4f3   :  { %373 = vst.msk [vmem:[#allocation2 + $0x1b] sm:$0x8] %vm344_vm7, %v325_v43 }
 0x4f7   :  { %v378_v47 = vld [vmem:[#allocation2] sm:$0xff] }
 0x4f8   :  { %v380_v45 = vld [vmem:[#allocation2 + $0x8] sm:$0xff] }
 0x4f9   :  { %790 = vmatmul.mubr.msk.f32.vlgmr.msra.gmra.mrb[4].mxu1 %vm218_vm3, %v380_v45  ;;  %v528_v49 = vld [vmem:[#allocation2 + $0x10] sm:$0xff] }
 0x4fa   :  { %793 = vmatpush3.msra.mxu1 %v379_v44  ;;  %794 = vmatprep.mubr.msk.f32.mxu1 %vm866_vm2, %v867_v5  ;;  %v604_v50 = vld [vmem:[#allocation2 + $0x18] sm:$0xff] }
 0x4fb   :  { %797 = vmatprep.subr.mxu1 %v867_v5 }
 0x4fd   :  { %795 = vmatmul.mubr.msk.f32.vlgmr.msra.gmra.mrb[6].mxu1 %vm218_vm3, %v378_v47 }
 0x4fe   :  { %798 = vmatpush3.msra.mxu1 %v529_v46  ;;  %799 = vmatprep.mubr.msk.f32.mxu1 %vm866_vm2, %v867_v5 }
 0x4ff   :  { %802 = vmatprep.subr.mxu1 %v867_v5 }
 0x501   :  { %800 = vmatmul.mubr.msk.f32.vlgmr.msra.gmra.mrb[8].mxu1 %vm218_vm3, %v528_v49 }
 0x502   :  { %803 = vmatpush3.msra.mxu1 %v605_v48  ;;  %804 = vmatprep.mubr.msk.f32.mxu1 %vm866_vm2, %v867_v5 }
 0x505   :  { %805 = vmatmul.mubr.msk.f32.vlgmr.msra.gmra.mrb[10].mxu1 %vm218_vm3, %v604_v50 }
 0x5cc   :  { %v451_v51 = vpop.f32.mrb[4].mxu1 }
 0x5cd   :  { %v791_v52 = vpop.f32.mrb[5].mxu1 }
 0x5d0   :  { %v524_v53 = vpop.f32.mrb[6].mxu1 }
 0x5d1   :  { %v525_v54 = vadd.f32 %v524_v53, %v451_v51  ;;  %v796_v55 = vpop.f32.mrb[7].mxu1 }
 0x5d4   :  { %v599_v56 = vpop.f32.mrb[8].mxu1 }
 0x5d5   :  { %v603_v57 = vadd.f32 %v599_v56, %v525_v54  ;;  %v801_v58 = vpop.f32.mrb[9].mxu1 }
 0x5d8   :  { %v675_v59 = vpop.f32.mrb[10].mxu1 }
 0x5d9   :  { %v679_v61 = vadd.f32 %v675_v59, %v603_v57  ;;  %v806_v62 = vpop.f32.mrb[11].mxu1 }
 0x5db   :  { %v687_v63 = vadd.f32 %v724_v60, %v679_v61 }
 0x5dd   :  { %689 = vst.msk [vmem:[#allocation3] sm:$0xff] %vm688_vm12, %v687_v63 }
 0x5de   :  { %852 = shalt.err (!%p849_p4)
}
 0x5df   :  { %s853_s29 = scalar_lea.hbm %s1046_s4, 128 }
 0x5e0   :  { %p854_p5 = scmp.ne.s32.totalorder %s1046_s4, %s853_s29  ;;  %p857_p6 = scmp.lt.u32.totalorder %s853_s29, %s1046_s4 }
 0x5e2   :  { %p859_p7 = pnand %p857_p6, %p854_p5 }
 0x5e4   :  { %862 = shalt.err (!%p859_p7)
}
 0x5e5   :  { %699 = dma.vmem_to_hbm [thread:$0]  %s697_s25, 128, %s1046_s4, [#allocation4]  }
 0x5e6   :  { %863 = dma.done.wait [#allocation4], 128  }
 0x5e7   :  { %864 = vsyncadd [#allocation4], 4294967168 }
 0x5e8   :  { %703 = vsyncpa [#allocation4], 1 }

</bundles_post_ra>
